<compile_context>
chip_gen: v5e
topology: v5e:2x2
jax: 0.10.0
libtpu: 0.0.40
codegen_flags: <defaults>
</compile_context>

<pallas_src>
import jax
import jax.numpy as jnp
from jax.experimental import pallas as pl
from jax.experimental.pallas import tpu as pltpu


def _matmul_kernel(x_ref, w_ref, b_ref, o_ref):
    # x_ref: (TM, r*C) activations (native dtype) in VMEM
    # w_ref: (r*C, r)  f32 folded weight/selector in VMEM (resident)
    # b_ref: (1, 1)    f32 scalar bias in SMEM
    # o_ref: (TM, r)   f32 output tile
    x = x_ref[...].astype(jnp.float32)
    o_ref[...] = (
        jnp.dot(x, w_ref[...], preferred_element_type=jnp.float32) + b_ref[0, 0]
    )


def _reduce_kernel(x_ref, w_ref, b_ref, o_ref):
    # Fallback when C cannot be lane-packed: VPU multiply + cross-lane reduce.
    # x_ref: (TM, C), w_ref: (1, C) f32, b_ref: (1, 1) f32 SMEM, o_ref: (TM, 1)
    x = x_ref[...].astype(jnp.float32)
    o_ref[...] = jnp.sum(x * w_ref[...], axis=-1, keepdims=True) + b_ref[0, 0]


def _round_up(v, mult):
    return ((v + mult - 1) // mult) * mult


def _pick_tile_rows(m_rows, row_bytes, itemsize, budget_bytes, block_m=None):
    """Rows per grid step.

    As large as the double-buffered VMEM budget allows, rounded to the dtype's
    native sublane multiple; split into >= 2 grid steps (v7x has 2 TensorCores)
    only when each half is still >= ~1 MiB so the split is worthwhile.
    """
    sub = 32 // itemsize  # 8 for f32, 16 for bf16, 32 for int8/fp8
    if m_rows <= sub:
        return m_rows  # full-extent block: always a legal block shape
    if block_m is not None:
        return _round_up(min(block_m, m_rows), sub)
    tm = max(sub, (budget_bytes // (2 * row_bytes)) // sub * sub)
    half = _round_up(pl.cdiv(m_rows, 2), sub)
    if half * row_bytes >= (1 << 20):
        tm = min(tm, half)
    return min(tm, _round_up(m_rows, sub))


def close_layer(x, weight, bias, *, block_m=None, vmem_budget_bytes=40 * 1024 * 1024):
    """Apply Linear(channels -> 1) to the last axis of x.

    x:      (..., C)  float32 / bfloat16
    weight: (1, C)    float32  (torch nn.Linear.weight layout)
    bias:   (1,)      float32
    returns (..., 1)  float32
    """
    *lead, c = x.shape
    m = 1
    for d in lead:
        m *= int(d)

    x2d = x.reshape(m, c)  # keep native dtype: no HBM upcast
    itemsize = x2d.dtype.itemsize
    w_flat = weight.reshape(c).astype(jnp.float32)
    b2d = bias.astype(jnp.float32).reshape(1, 1)

    # Lane densification for small C: fold r = 128 // C rows into one 128-lane
    # row and contract on the MXU against a (r*C, r) folded weight/selector.
    r = (128 // c) if c < 128 else 0
    packed = (r >= 2) and (128 % c == 0) and (m % r == 0)

    if packed:
        kernel = _matmul_kernel
        m_eff, c_eff, n_out = m // r, r * c, r
        x_eff = x2d.reshape(m_eff, c_eff)  # free row-major reshape (no copy)
        lanes = jnp.arange(c_eff)
        w_eff = jnp.where(
            (lanes[:, None] // c) == jnp.arange(r)[None, :],
            w_flat[lanes % c][:, None],
            jnp.float32(0.0),
        )  # Wsel[l, g] = w[l % C] if l // C == g else 0
    else:
        kernel = _reduce_kernel
        m_eff, c_eff, n_out = m, c, 1
        x_eff = x2d
        w_eff = w_flat.reshape(1, c)

    row_bytes = c_eff * itemsize
    tm = _pick_tile_rows(m_eff, row_bytes, itemsize, vmem_budget_bytes, block_m)
    # Ragged last block handled by Pallas masking: OOB rows only produce output
    # rows that are never stored to HBM.
    grid = (pl.cdiv(m_eff, tm),)

    cost = pl.CostEstimate(
        flops=2 * m * c,
        transcendentals=0,
        bytes_accessed=m * c * itemsize + m * 4 + c * 4,
    )

    out = pl.pallas_call(
        kernel,
        out_shape=jax.ShapeDtypeStruct((m_eff, n_out), jnp.float32),
        grid=grid,
        in_specs=[
            pl.BlockSpec((tm, c_eff), lambda i: (i, 0)),          # x tile (auto double-buffered)
            pl.BlockSpec(w_eff.shape, lambda i: (0, 0)),          # resident weight
            pl.BlockSpec(memory_space=pltpu.MemorySpace.SMEM),    # scalar bias
        ],
        out_specs=pl.BlockSpec((tm, n_out), lambda i: (i, 0)),
        compiler_params=pltpu.CompilerParams(
            dimension_semantics=("parallel",),       # shard rows across v7x's 2 TCs
            vmem_limit_bytes=48 * 1024 * 1024,       # safe on v7x (64 MiB VMEM/TC)
        ),
        cost_estimate=cost,
    )(x_eff, w_eff, b2d)

    return out.reshape(*lead, 1)


def _reference(x, weight, bias):
    # Exact f32 elementwise reference (no MXU): sum(x * w) + b.
    return (x.astype(jnp.float32) * weight.reshape(-1)).sum(-1, keepdims=True) + bias


if __name__ == "__main__":
    key = jax.random.PRNGKey(0)
    k_x, k_w, k_b, k_x2, k_x3, k_x4 = jax.random.split(key, 6)

    channels = 32
    batch, seq = 2, 8

    # Parameter init mimicking torch nn.Linear's uniform(-1/sqrt(C), 1/sqrt(C)).
    bound = 1.0 / jnp.sqrt(jnp.float32(channels))
    weight = jax.random.uniform(k_w, (1, channels), jnp.float32, -bound, bound)
    bias = jax.random.uniform(k_b, (1,), jnp.float32, -bound, bound)

    # --- small case: lane-packed MXU path, single tile ---
    x = jax.random.normal(k_x, (batch, seq, channels), jnp.float32)
    y = jax.block_until_ready(close_layer(x, weight, bias))
    y_ref = _reference(x, weight, bias)
    assert y.shape == (batch, seq, 1)
    assert jnp.allclose(y, y_ref, atol=1e-4, rtol=1e-4)

    # --- ragged fallback path: M=111 not divisible by r=4 -> VPU reduce kernel,
    #     grid of 7 with a partial last block (no padding) ---
    x2 = jax.random.normal(k_x2, (3, 37, channels), jnp.float32)
    y2 = jax.block_until_ready(close_layer(x2, weight, bias, block_m=16))
    y2_ref = _reference(x2, weight, bias)
    assert y2.shape == (3, 37, 1)
    assert jnp.allclose(y2, y2_ref, atol=1e-4, rtol=1e-4)

    # --- lane-packed MXU path with multiple tiles and a ragged last block ---
    x3 = jax.random.normal(k_x3, (3, 40, channels), jnp.float32)
    y3 = jax.block_until_ready(close_layer(x3, weight, bias, block_m=8))
    y3_ref = _reference(x3, weight, bias)
    assert y3.shape == (3, 40, 1)
    assert jnp.allclose(y3, y3_ref, atol=1e-4, rtol=1e-4)

    # --- bf16 activations: native-dtype HBM traffic, in-kernel f32 upcast ---
    x4 = jax.random.normal(k_x4, (4, 16, channels), jnp.float32).astype(jnp.bfloat16)
    y4 = jax.block_until_ready(close_layer(x4, weight, bias))
    y4_ref = _reference(x4, weight, bias)
    assert y4.shape == (4, 16, 1)
    assert jnp.allclose(y4, y4_ref, atol=1e-4, rtol=1e-4)

    print("KERNEL_OK")
</pallas_src>

<mosaic_0001>
module attributes {stable_mosaic.version = 11 : i64} {
  func.func @_matmul_kernel(%arg0: i32, %arg1: memref<4x128xf32, #tpu.memory_space<vmem>>, %arg2: memref<128x4xf32, #tpu.memory_space<vmem>>, %arg3: memref<1x1xf32, #tpu.memory_space<smem>>, %arg4: memref<4x4xf32, #tpu.memory_space<vmem>>) attributes {dimension_semantics = [#tpu.dimension_semantics<parallel>], iteration_bounds = array<i64: 1>, scalar_prefetch = 0 : i64, scratch_operands = 0 : i64, tpu.core_type = #tpu.core_type<tc>, window_params = [{transform_indices = @transform_0, window_bounds = array<i64: 4, 128>}, {pipeline_mode = #tpu.pipeline_mode<synchronous>, transform_indices = @transform_1, window_bounds = array<i64: 128, 4>}, {transform_indices = @transform_2, window_bounds = array<i64: 1, 1>}, {transform_indices = @transform_3, window_bounds = array<i64: 4, 4>}]} {
    %c0 = arith.constant 0 : index
    %c0_0 = arith.constant 0 : index
    %0 = vector.load %arg1[%c0, %c0_0] : memref<4x128xf32, #tpu.memory_space<vmem>>, vector<4x128xf32>
    %c0_1 = arith.constant 0 : index
    %c0_2 = arith.constant 0 : index
    %1 = vector.load %arg2[%c0_1, %c0_2] : memref<128x4xf32, #tpu.memory_space<vmem>>, vector<128x4xf32>
    %cst = arith.constant dense<0.000000e+00> : vector<4x4xf32>
    %2 = tpu.matmul %0, %1, %cst {dimension_numbers = #tpu.dot_dimension_numbers<[1], [0], [0], [1], [0, 0, 1, 1], [], []>} : vector<4x128xf32>, vector<128x4xf32>, vector<4x4xf32> -> vector<4x4xf32>
    %c0_3 = arith.constant 0 : index
    %c0_4 = arith.constant 0 : index
    %3 = memref.load %arg3[%c0_3, %c0_4] : memref<1x1xf32, #tpu.memory_space<smem>>
    %4 = vector.broadcast %3 : f32 to vector<4x4xf32>
    %5 = arith.addf %2, %4 : vector<4x4xf32>
    %c0_5 = arith.constant 0 : index
    %c0_6 = arith.constant 0 : index
    %6 = vector.load %arg4[%c0_5, %c0_6] : memref<4x4xf32, #tpu.memory_space<vmem>>, vector<4x4xf32>
    tpu.vector_store %arg4[%c0_5, %c0_6], %5 {strides = array<i32>} : memref<4x4xf32, #tpu.memory_space<vmem>>, vector<4x4xf32>,
    return
  }
  func.func @transform_0(%arg0: i32) -> (i32, i32) {
    %c0_i32 = arith.constant 0 : i32
    %c0_i32_0 = arith.constant 0 : i32
    return %arg0, %c0_i32 : i32, i32
  }
  func.func @transform_1(%arg0: i32) -> (i32, i32) {
    %c0_i32 = arith.constant 0 : i32
    %c0_i32_0 = arith.constant 0 : i32
    %c0_i32_1 = arith.constant 0 : i32
    return %c0_i32, %c0_i32_0 : i32, i32
  }
  func.func @transform_2(%arg0: i32) -> (i32, i32) {
    %c0_i32 = arith.constant 0 : i32
    %c0_i32_0 = arith.constant 0 : i32
    %c0_i32_1 = arith.constant 0 : i32
    return %c0_i32, %c0_i32_0 : i32, i32
  }
  func.func @transform_3(%arg0: i32) -> (i32, i32) {
    %c0_i32 = arith.constant 0 : i32
    %c0_i32_0 = arith.constant 0 : i32
    return %arg0, %c0_i32 : i32, i32
  }
}

</mosaic_0001>

<bundles_post_ra>
// kernel: tpu_custom_call.1
= control target key start
LH: loop header
LB: loop body
LE: loop exit
PB: predicated region body
PF: predicated region fallthrough
CT: control target
= control target key end

     0   :  { %s178_s0 = inlined_call_operand.vmem [shape: f32[4,128], index: 0, kind: input, shape index: {}]   ;;  %s179_s1 = inlined_call_operand.vmem [shape: f32[128,4], index: 1, kind: input, shape index: {}]   ;;  %s180_s2 = inlined_call_operand.<no memory space> [shape: f32[1,1], index: 2, kind: input, shape index: {}]   ;;  %s181_s3 = inlined_call_operand.hbm [shape: f32[4,4], index: 3, kind: output, shape index: {}]  }
   0x1   :  { %v32_v0 = vld [vmem:[%s179_s1 + $0x78] sm:$0xff]  ;;  %v31_v1 = vld [vmem:[%s179_s1 + $0x70] sm:$0xff]  ;;  %v30_v2 = vld [vmem:[%s179_s1 + $0x68] sm:$0xff] }
   0x2   :  { %35 = vmatpush.msra.mxu0 %v32_v0  ;;  %v29_v3 = vld [vmem:[%s179_s1 + $0x60] sm:$0xff] }
   0x4   :  { %36 = vmatpush.msra.mxu0 %v31_v1 }
   0x6   :  { %37 = vmatpush.msra.mxu0 %v30_v2 }
   0x7   :  { %9 = vsyncpa [#allocation4], 0  ;;  %v28_v4 = vld [vmem:[%s179_s1 + $0x58] sm:$0xff]  ;;  %v27_v5 = vld [vmem:[%s179_s1 + $0x50] sm:$0xff]  ;;  %v34_v17 = vstv %s180_s2  ;;  %s100_s21 = smov [#allocation3]   ;;  %s64_s25 = sshll.u32 %s181_s3, 4  ;;  %s65_s25 = int_to_ptr.hbm [resolvable:$true] %s64_s25 }
   0x8   :  { %38 = vmatpush.msra.mxu0 %v29_v3  ;;  %v26_v6 = vld [vmem:[%s179_s1 + $0x48] sm:$0xff]  ;;  %v25_v7 = vld [vmem:[%s179_s1 + $0x40] sm:$0xff]  ;;  %v24_v8 = vld [vmem:[%s179_s1 + $0x38] sm:$0xff]  ;;  %s62_s22 = sshll.u32 %s100_s21, 4  ;;  %vm55_vm0 = vcmask 27648   ;;  %s63_s22 = int_to_ptr.vmem [resolvable:$true] %s62_s22 }
   0x9   :  { %v23_v9 = vld [vmem:[%s179_s1 + $0x30] sm:$0xff]  ;;  %v22_v10 = vld [vmem:[%s179_s1 + $0x28] sm:$0xff]  ;;  %v21_v11 = vld [vmem:[%s179_s1 + $0x20] sm:$0xff] }
   0xa   :  { %39 = vmatpush.msra.mxu0 %v28_v4  ;;  %v20_v12 = vld [vmem:[%s179_s1 + $0x18] sm:$0xff]  ;;  %v19_v13 = vld [vmem:[%s179_s1 + $0x10] sm:$0xff]  ;;  %v18_v14 = vld [vmem:[%s179_s1 + $0x8] sm:$0xff] }
   0xb   :  { %v17_v15 = vld [vmem:[%s179_s1] sm:$0xff] }
   0xc   :  { %40 = vmatpush.msra.mxu0 %v27_v5  ;;  %v16_v16 = vld [vmem:[%s178_s0] sm:$0xf] }
   0xe   :  { %41 = vmatpush.msra.mxu0 %v26_v6 }
  0x10   :  { %42 = vmatpush.msra.mxu0 %v25_v7 }
  0x12   :  { %43 = vmatpush.msra.mxu0 %v24_v8 }
  0x14   :  { %44 = vmatpush.msra.mxu0 %v23_v9 }
  0x16   :  { %45 = vmatpush.msra.mxu0 %v22_v10 }
  0x18   :  { %46 = vmatpush.msra.mxu0 %v21_v11 }
  0x1a   :  { %47 = vmatpush.msra.mxu0 %v20_v12 }
  0x1c   :  { %48 = vmatpush.msra.mxu0 %v19_v13 }
  0x1e   :  { %49 = vmatpush.msra.mxu0 %v18_v14 }
  0x20   :  { %50 = vmatpush.msra.mxu0 %v17_v15 }
  0x21   :  { %51 = vmatmul.f32.vlgmr.msra.gmra.mxu0 %v16_v16 }
  0x9e   :  { %v52_v18 = vpop.f32.mrf.mxu0 }
  0x9f   :  { %v53_v19 = vadd.f32 %v52_v18, %v34_v17 }
  0xa1   :  { %56 = vst.msk [vmem:[#allocation3] sm:$0xf] %vm55_vm0, %v53_v19 }
  0xa2   :  { %67 = dma.vmem_to_hbm [thread:$0]  %s63_s22, 64, %s65_s25, [#allocation4]  }
  0xa3   :  { %98 = dma.done.wait [#allocation4], 64  }
  0xa4   :  { %99 = vsyncadd [#allocation4], 4294967232 }
  0xa5   :  { %72 = vsyncpa [#allocation4], 1 }

</bundles_post_ra>
